<compile_context>
chip_gen: v7x
topology: tpu7x:2x2x1
jax: 0.10.0
libtpu: 0.0.40
codegen_flags: <defaults>
</compile_context>

<pallas_src>
import functools
import math

import jax
import jax.numpy as jnp
import numpy as np
from jax.experimental import pallas as pl
from jax.experimental.pallas import tpu as pltpu


# ----------------------------------------------------------------------------
# Kernel
# ----------------------------------------------------------------------------
def _resbn_kernel(x_ref, w1s_ref, shift1_ref, w2_ref, shift2_ref, out_ref,
                  *, hidden_size, has_skip, matmul_dtype):
    x = x_ref[...]                                            # (bm, In)
    xm = x if matmul_dtype is None else x.astype(matmul_dtype)

    # One MXU push: [ layer1(x)*s1 | skip(x) ]   (skip column block only if present)
    both = jnp.dot(xm, w1s_ref[...], preferred_element_type=jnp.float32)

    # o = relu(bn1(layer1(x)))  -- BN scale folded into weights -> add + relu only.
    o = jnp.maximum(both[:, :hidden_size] + shift1_ref[...], 0.0)
    om = o if matmul_dtype is None else o.astype(matmul_dtype)

    # residual * scale_factor = o @ (W2^T * s2 * sf) + shift2   (all pre-folded)
    res = jnp.dot(om, w2_ref[...], preferred_element_type=jnp.float32) + shift2_ref[...]

    identity = both[:, hidden_size:] if has_skip else x.astype(jnp.float32)
    out_ref[...] = jnp.maximum(identity + res, 0.0).astype(out_ref.dtype)


# ----------------------------------------------------------------------------
# One-time parameter preprocessing (keep OUT of the per-call hot path)
# ----------------------------------------------------------------------------
def prepare_resbn_params(params, *, scale_factor=1.0, eps=1e-5, matmul_dtype=None):
    """Fold BN, linear biases and scale_factor into fused weights/shifts."""
    w1 = params["w1"]                     # (H, In)
    w2 = params["w2"]                     # (Out, H)
    H, In = w1.shape
    Out = w2.shape[0]

    s1 = params["g1"] / jnp.sqrt(params["v1"] + eps)
    t1 = (params["b1"] - params["m1"]) * s1 + params["beta1"]
    s2 = params["g2"] / jnp.sqrt(params["v2"] + eps)
    t2 = (params["b2"] - params["m2"]) * s2 + params["beta2"]

    w1_f = w1.T * s1[None, :]                                  # (In, H)
    w2_f = w2.T * (s2 * scale_factor)[None, :]                 # (H, Out)
    shift1 = t1.reshape(1, H).astype(jnp.float32)
    shift2 = (t2 * scale_factor).reshape(1, Out).astype(jnp.float32)

    has_skip = "wskip" in params
    if has_skip:
        w1s = jnp.concatenate([w1_f, params["wskip"].T], axis=1)   # (In, H + Out)
    else:
        if In != Out:
            raise ValueError("Identity skip requires input_size == output_size "
                             f"(got In={In}, Out={Out}); pass 'wskip' instead.")
        w1s = w1_f                                                 # (In, H)

    if matmul_dtype is not None:
        # Pre-cast weights in HBM (halves weight DMA; no per-step in-kernel cast).
        w1s = w1s.astype(matmul_dtype)
        w2_f = w2_f.astype(matmul_dtype)

    return dict(w1s=w1s, shift1=shift1, w2=w2_f, shift2=shift2,
                hidden_size=H, output_size=Out, has_skip=has_skip,
                matmul_dtype=matmul_dtype)


# ----------------------------------------------------------------------------
# pallas_call wrapper
# ----------------------------------------------------------------------------
def res_bn_block(x, fused, *, num_batch_blocks=None, vmem_limit_bytes=None):
    """x: (B, input_size).  `fused` comes from prepare_resbn_params."""
    B, In = x.shape
    H, Out = fused["hidden_size"], fused["output_size"]
    has_skip = fused["has_skip"]
    w1s, w2 = fused["w1s"], fused["w2"]
    shift1, shift2 = fused["shift1"], fused["shift2"]
    matmul_dtype = fused["matmul_dtype"]

    if num_batch_blocks is None:
        # Only split the batch when each block keeps >= 256 rows (MXU-bound,
        # amortizes fill/drain); otherwise one grid step (no pipeline overhead).
        num_batch_blocks = 2 if (B % 2 == 0 and B // 2 >= 256) else 1
    assert B % num_batch_blocks == 0
    bm = B // num_batch_blocks

    kernel = functools.partial(_resbn_kernel, hidden_size=H, has_skip=has_skip,
                               matmul_dtype=matmul_dtype)

    w_cols = w1s.shape[1]
    flops = 2 * B * In * w_cols + 2 * B * H * Out + 4 * B * (H + Out)
    bytes_accessed = (x.size * x.dtype.itemsize
                      + w1s.size * w1s.dtype.itemsize
                      + w2.size * w2.dtype.itemsize
                      + shift1.size * 4 + shift2.size * 4
                      + B * Out * x.dtype.itemsize)
    cost = pl.CostEstimate(flops=flops, transcendentals=0,
                           bytes_accessed=bytes_accessed)

    return pl.pallas_call(
        kernel,
        out_shape=jax.ShapeDtypeStruct((B, Out), x.dtype),
        grid_spec=pltpu.PrefetchScalarGridSpec(
            num_scalar_prefetch=0,
            grid=(num_batch_blocks,),
            in_specs=[
                pl.BlockSpec((bm, In), lambda i: (i, 0)),        # x
                pl.BlockSpec((In, w_cols), lambda i: (0, 0)),    # [W1^T*s1 | Wskip^T]
                pl.BlockSpec((1, H), lambda i: (0, 0)),          # shift1 (bias+BN1 folded)
                pl.BlockSpec((H, Out), lambda i: (0, 0)),        # W2^T*s2*scale_factor
                pl.BlockSpec((1, Out), lambda i: (0, 0)),        # shift2 (bias+BN2+sf folded)
            ],
            out_specs=pl.BlockSpec((bm, Out), lambda i: (i, 0)),
        ),
        compiler_params=pltpu.CompilerParams(
            dimension_semantics=("parallel",),
            vmem_limit_bytes=vmem_limit_bytes),
        cost_estimate=cost,
    )(x, w1s, shift1, w2, shift2)


# ----------------------------------------------------------------------------
# Pure-JAX reference (mirrors ResBN_Block.forward, inference-mode BN)
# ----------------------------------------------------------------------------
def _reference(x, params, *, scale_factor=1.0, eps=1e-5):
    def bn(z, g, beta, m, v):
        return (z - m) / jnp.sqrt(v + eps) * g + beta

    identity = x @ params["wskip"].T if "wskip" in params else x
    o = jax.nn.relu(bn(x @ params["w1"].T + params["b1"],
                       params["g1"], params["beta1"], params["m1"], params["v1"]))
    residual = bn(o @ params["w2"].T + params["b2"],
                  params["g2"], params["beta2"], params["m2"], params["v2"])
    return jax.nn.relu(identity + residual * scale_factor)


def _make_params(key, In, H, Out, *, with_skip):
    ks = jax.random.split(key, 12)
    p = {
        "w1": jax.random.normal(ks[0], (H, In), jnp.float32) / math.sqrt(In),
        "b1": 0.1 * jax.random.normal(ks[1], (H,), jnp.float32),
        "w2": jax.random.normal(ks[2], (Out, H), jnp.float32) / math.sqrt(H),
        "b2": 0.1 * jax.random.normal(ks[3], (Out,), jnp.float32),
        "g1": 1.0 + 0.1 * jax.random.normal(ks[4], (H,), jnp.float32),
        "beta1": 0.1 * jax.random.normal(ks[5], (H,), jnp.float32),
        "m1": 0.1 * jax.random.normal(ks[6], (H,), jnp.float32),
        "v1": jnp.abs(1.0 + 0.1 * jax.random.normal(ks[7], (H,), jnp.float32)),
        "g2": 1.0 + 0.1 * jax.random.normal(ks[8], (Out,), jnp.float32),
        "beta2": 0.1 * jax.random.normal(ks[9], (Out,), jnp.float32),
        "m2": 0.05 * jnp.ones((Out,), jnp.float32),
        "v2": 1.2 * jnp.ones((Out,), jnp.float32),
    }
    if with_skip:
        p["wskip"] = jax.random.normal(ks[10], (Out, In), jnp.float32) / math.sqrt(In)
    return p


if __name__ == "__main__":
    key = jax.random.PRNGKey(0)
    k_a, k_b, k_xa, k_xb = jax.random.split(key, 4)
    scale_factor = 0.5

    # Case A: input_size != output_size -> skip_layer is a bias-free Linear.
    # (hidden_size == output_size, as the module's bn2 sizing requires.)
    B, In, H, Out = 16, 64, 128, 128
    x_a = jax.random.normal(k_xa, (B, In), jnp.float32)
    params_a = _make_params(k_a, In, H, Out, with_skip=True)
    fused_a = prepare_resbn_params(params_a, scale_factor=scale_factor)
    out_a = jax.block_until_ready(res_bn_block(x_a, fused_a))
    ref_a = _reference(x_a, params_a, scale_factor=scale_factor)
    np.testing.assert_allclose(np.asarray(out_a), np.asarray(ref_a),
                               rtol=1e-4, atol=1e-4)

    # Case B: input_size == output_size -> nn.Identity skip (x added in-kernel).
    B, In, H, Out = 16, 128, 128, 128
    x_b = jax.random.normal(k_xb, (B, In), jnp.float32)
    params_b = _make_params(k_b, In, H, Out, with_skip=False)
    fused_b = prepare_resbn_params(params_b, scale_factor=scale_factor)
    out_b = jax.block_until_ready(res_bn_block(x_b, fused_b))
    ref_b = _reference(x_b, params_b, scale_factor=scale_factor)
    np.testing.assert_allclose(np.asarray(out_b), np.asarray(ref_b),
                               rtol=1e-4, atol=1e-4)

    print("KERNEL_OK")
</pallas_src>

<mosaic_0001>
module attributes {stable_mosaic.version = 11 : i64} {
  func.func @_resbn_kernel(%arg0: i32, %arg1: memref<16x64xf32, #tpu.memory_space<vmem>>, %arg2: memref<64x256xf32, #tpu.memory_space<vmem>>, %arg3: memref<1x128xf32, #tpu.memory_space<vmem>>, %arg4: memref<128x128xf32, #tpu.memory_space<vmem>>, %arg5: memref<1x128xf32, #tpu.memory_space<vmem>>, %arg6: memref<16x128xf32, #tpu.memory_space<vmem>>) attributes {dimension_semantics = [#tpu.dimension_semantics<parallel>], iteration_bounds = array<i64: 1>, scalar_prefetch = 0 : i64, scratch_operands = 0 : i64, tpu.core_type = #tpu.core_type<tc>, window_params = [{transform_indices = @transform_0, window_bounds = array<i64: 16, 64>}, {pipeline_mode = #tpu.pipeline_mode<synchronous>, transform_indices = @transform_1, window_bounds = array<i64: 64, 256>}, {pipeline_mode = #tpu.pipeline_mode<synchronous>, transform_indices = @transform_2, window_bounds = array<i64: 1, 128>}, {pipeline_mode = #tpu.pipeline_mode<synchronous>, transform_indices = @transform_3, window_bounds = array<i64: 128, 128>}, {pipeline_mode = #tpu.pipeline_mode<synchronous>, transform_indices = @transform_4, window_bounds = array<i64: 1, 128>}, {transform_indices = @transform_5, window_bounds = array<i64: 16, 128>}]} {
    %c0 = arith.constant 0 : index
    %c0_0 = arith.constant 0 : index
    %0 = vector.load %arg1[%c0, %c0_0] : memref<16x64xf32, #tpu.memory_space<vmem>>, vector<16x64xf32>
    %c0_1 = arith.constant 0 : index
    %c0_2 = arith.constant 0 : index
    %1 = vector.load %arg2[%c0_1, %c0_2] : memref<64x256xf32, #tpu.memory_space<vmem>>, vector<64x256xf32>
    %cst = arith.constant dense<0.000000e+00> : vector<16x256xf32>
    %2 = tpu.matmul %0, %1, %cst {dimension_numbers = #tpu.dot_dimension_numbers<[1], [0], [0], [1], [0, 0, 1, 1], [], []>} : vector<16x64xf32>, vector<64x256xf32>, vector<16x256xf32> -> vector<16x256xf32>
    %3 = vector.extract_strided_slice %2 {offsets = [0, 0], sizes = [16, 128], strides = [1, 1]} : vector<16x256xf32> to vector<16x128xf32>
    %c0_3 = arith.constant 0 : index
    %c0_4 = arith.constant 0 : index
    %4 = vector.load %arg3[%c0_3, %c0_4] : memref<1x128xf32, #tpu.memory_space<vmem>>, vector<1x128xf32>
    %5 = vector.broadcast %4 : vector<1x128xf32> to vector<16x128xf32>
    %6 = arith.addf %3, %5 : vector<16x128xf32>
    %cst_5 = arith.constant 0.000000e+00 : f32
    %7 = vector.broadcast %cst_5 : f32 to vector<16x128xf32>
    %8 = arith.maximumf %6, %7 : vector<16x128xf32>
    %c0_6 = arith.constant 0 : index
    %c0_7 = arith.constant 0 : index
    %9 = vector.load %arg4[%c0_6, %c0_7] : memref<128x128xf32, #tpu.memory_space<vmem>>, vector<128x128xf32>
    %cst_8 = arith.constant dense<0.000000e+00> : vector<16x128xf32>
    %10 = tpu.matmul %8, %9, %cst_8 {dimension_numbers = #tpu.dot_dimension_numbers<[1], [0], [0], [1], [0, 0, 1, 1], [], []>} : vector<16x128xf32>, vector<128x128xf32>, vector<16x128xf32> -> vector<16x128xf32>
    %c0_9 = arith.constant 0 : index
    %c0_10 = arith.constant 0 : index
    %11 = vector.load %arg5[%c0_9, %c0_10] : memref<1x128xf32, #tpu.memory_space<vmem>>, vector<1x128xf32>
    %12 = vector.broadcast %11 : vector<1x128xf32> to vector<16x128xf32>
    %13 = arith.addf %10, %12 : vector<16x128xf32>
    %14 = vector.extract_strided_slice %2 {offsets = [0, 128], sizes = [16, 128], strides = [1, 1]} : vector<16x256xf32> to vector<16x128xf32>
    %15 = arith.addf %14, %13 : vector<16x128xf32>
    %cst_11 = arith.constant 0.000000e+00 : f32
    %16 = vector.broadcast %cst_11 : f32 to vector<16x128xf32>
    %17 = arith.maximumf %15, %16 : vector<16x128xf32>
    %c0_12 = arith.constant 0 : index
    %c0_13 = arith.constant 0 : index
    %18 = vector.load %arg6[%c0_12, %c0_13] : memref<16x128xf32, #tpu.memory_space<vmem>>, vector<16x128xf32>
    tpu.vector_store %arg6[%c0_12, %c0_13], %17 {strides = array<i32>} : memref<16x128xf32, #tpu.memory_space<vmem>>, vector<16x128xf32>,
    return
  }
  func.func @transform_0(%arg0: i32) -> (i32, i32) {
    %c0_i32 = arith.constant 0 : i32
    %c0_i32_0 = arith.constant 0 : i32
    return %arg0, %c0_i32 : i32, i32
  }
  func.func @transform_1(%arg0: i32) -> (i32, i32) {
    %c0_i32 = arith.constant 0 : i32
    %c0_i32_0 = arith.constant 0 : i32
    %c0_i32_1 = arith.constant 0 : i32
    return %c0_i32, %c0_i32_0 : i32, i32
  }
  func.func @transform_2(%arg0: i32) -> (i32, i32) {
    %c0_i32 = arith.constant 0 : i32
    %c0_i32_0 = arith.constant 0 : i32
    %c0_i32_1 = arith.constant 0 : i32
    return %c0_i32, %c0_i32_0 : i32, i32
  }
  func.func @transform_3(%arg0: i32) -> (i32, i32) {
    %c0_i32 = arith.constant 0 : i32
    %c0_i32_0 = arith.constant 0 : i32
    %c0_i32_1 = arith.constant 0 : i32
    return %c0_i32, %c0_i32_0 : i32, i32
  }
  func.func @transform_4(%arg0: i32) -> (i32, i32) {
    %c0_i32 = arith.constant 0 : i32
    %c0_i32_0 = arith.constant 0 : i32
    %c0_i32_1 = arith.constant 0 : i32
    return %c0_i32, %c0_i32_0 : i32, i32
  }
  func.func @transform_5(%arg0: i32) -> (i32, i32) {
    %c0_i32 = arith.constant 0 : i32
    %c0_i32_0 = arith.constant 0 : i32
    return %arg0, %c0_i32 : i32, i32
  }
}

</mosaic_0001>

<bundles_post_ra>
// kernel: tpu_custom_call.1
= control target key start
LH: loop header
LB: loop body
LE: loop exit
PB: predicated region body
PF: predicated region fallthrough
CT: control target
= control target key end

     0   :  { %10 = vsyncpa [#allocation3], 0  ;;  %s607_s0 = inlined_call_operand.hbm [shape: f32[16,64], index: 0, kind: input, shape index: {}]   ;;  %s608_s1 = inlined_call_operand.hbm [shape: f32[64,256], index: 1, kind: input, shape index: {}]   ;;  %s609_s2 = inlined_call_operand.vmem [shape: f32[1,128], index: 2, kind: input, shape index: {}]   ;;  %s610_s3 = inlined_call_operand.hbm [shape: f32[128,128], index: 3, kind: input, shape index: {}]   ;;  %s611_s4 = inlined_call_operand.vmem [shape: f32[1,128], index: 4, kind: input, shape index: {}]   ;;  %s612_s5 = inlined_call_operand.hbm [shape: f32[16,128], index: 5, kind: output, shape index: {}]  }
   0x1   :  { %11 = vsyncpa [#allocation6], 0 }
   0x2   :  { %12 = vsyncpa [#allocation4], 0  ;;  %s505_s18 = smov [#allocation5]   ;;  %s411_s22 = scalar_lea.hbm %s608_s1, 2048 }
   0x3   :  { %s30_s19 = sshll.u32 %s505_s18, 4  ;;  %p412_p0 = scmp.ne.s32.totalorder %s608_s1, %s411_s22  ;;  %s31_s19 = int_to_ptr.vmem [resolvable:$true] %s30_s19 }
   0x4   :  { %p415_p1 = scmp.lt.u32.totalorder %s411_s22, %s608_s1 }
   0x6   :  { %p417_p2 = pnand %p415_p1, %p412_p0 }
   0x8   :  { %420 = shalt.err (!%p417_p2)
}
   0x9   :  { %s421_s27 = scalar_lea.vmem %s31_s19, 2048  ;;  %p426_p4 = scmp.lt.s32.totalorder %s31_s19, %s31_s19 }
   0xa   :  { %p422_p3 = scmp.ne.s32.totalorder %s31_s19, %s421_s27  ;;  %p427_p5 = scmp.lt.s32.totalorder %s421_s27, %s421_s27 }
   0xc   :  { %p428_p6 = por %p427_p5, %p426_p4 }
   0xe   :  { %p429_p7 = pnand %p428_p6, %p422_p3 }
  0x10   :  { %432 = shalt.err (!%p429_p7)
}
  0x11   :  { %s506_s28 = smov 256   ;;  %s507_s29 = smov 16  }
  0x12   :  { %36 = dma.hbm_to_vmem [thread:$0]  %s608_s1, 2048, %s31_s19, [#allocation6], %s506_s28, %s506_s28, %s507_s29  }
  0x13   :  { %s508_s7 = smov [#allocation2]   ;;  %s433_s11 = scalar_lea.hbm %s607_s0, 256 }
  0x14   :  { %s18_s8 = sshll.u32 %s508_s7, 4  ;;  %p434_p8 = scmp.ne.s32.totalorder %s607_s0, %s433_s11  ;;  %s19_s8 = int_to_ptr.vmem [resolvable:$true] %s18_s8 }
  0x15   :  { %p437_p9 = scmp.lt.u32.totalorder %s433_s11, %s607_s0 }
  0x17   :  { %p439_p10 = pnand %p437_p9, %p434_p8 }
  0x19   :  { %442 = shalt.err (!%p439_p10)
}
  0x1a   :  { %s443_s16 = scalar_lea.vmem %s19_s8, 256  ;;  %p448_p12 = scmp.lt.s32.totalorder %s19_s8, %s19_s8 }
  0x1b   :  { %p444_p11 = scmp.ne.s32.totalorder %s19_s8, %s443_s16  ;;  %p449_p13 = scmp.lt.s32.totalorder %s443_s16, %s443_s16 }
  0x1d   :  { %p450_p0 = por %p449_p13, %p448_p12 }
  0x1f   :  { %p451_p1 = pnand %p450_p0, %p444_p11 }
  0x21   :  { %454 = shalt.err (!%p451_p1)
}
  0x22   :  { %s509_s1 = smov 128   ;;  %s510_s17 = smov 8  }
  0x23   :  { %24 = dma.hbm_to_vmem [thread:$0]  %s607_s0, 256, %s19_s8, [#allocation3], %s509_s1, %s509_s1, %s510_s17  }
  0x24   :  { %s511_s20 = smov [#allocation7]   ;;  %s455_s24 = scalar_lea.hbm %s610_s3, 2048 }
  0x25   :  { %s44_s21 = sshll.u32 %s511_s20, 4  ;;  %p456_p2 = scmp.ne.s32.totalorder %s610_s3, %s455_s24  ;;  %s45_s21 = int_to_ptr.vmem [resolvable:$true] %s44_s21 }
  0x26   :  { %p459_p3 = scmp.lt.u32.totalorder %s455_s24, %s610_s3 }
  0x28   :  { %p461_p4 = pnand %p459_p3, %p456_p2 }
  0x2a   :  { %464 = shalt.err (!%p461_p4)
}
  0x2b   :  { %s465_s29 = scalar_lea.vmem %s45_s21, 2048  ;;  %p470_p6 = scmp.lt.s32.totalorder %s45_s21, %s45_s21 }
  0x2c   :  { %p466_p5 = scmp.ne.s32.totalorder %s45_s21, %s465_s29  ;;  %p471_p7 = scmp.lt.s32.totalorder %s465_s29, %s465_s29 }
  0x2e   :  { %p472_p8 = por %p471_p7, %p470_p6 }
  0x30   :  { %p473_p9 = pnand %p472_p8, %p466_p5 }
  0x32   :  { %476 = shalt.err (!%p473_p9)
}
  0x33   :  { %50 = dma.hbm_to_vmem [thread:$0]  %s610_s3, 2048, %s45_s21, [#allocation6], %s509_s1, %s509_s1, %s510_s17  }
  0x34   :  { %499 = dma.done.wait [#allocation3], 256  }
  0x35   :  { %500 = vsyncadd [#allocation3], 4294967040 }
  0x36   :  { %501 = dma.done.wait [#allocation6], 4096  }
  0x37   :  { %502 = vsyncadd [#allocation6], 4294963200  ;;  %v512_v0 = vmov 0.0   ;;  %v65_v1 = vld [vmem:[#allocation5 + $0x8] sm:$0xff]  ;;  %v67_v2 = vld [vmem:[#allocation5 + $0x18] sm:$0xff]  ;;  %vm80_vm0 = vcmask 523264  }
  0x38   :  { %151 = vmatprep.mubr.f32.mxu0 %v512_v0  ;;  %v64_v3 = vld [vmem:[#allocation5] sm:$0xff]  ;;  %v354_v4 = vpack.c.bf16 %v67_v2, %v65_v1  ;;  %v66_v5 = vld [vmem:[#allocation5 + $0x10] sm:$0xff]  ;;  %v69_v6 = vld [vmem:[#allocation5 + $0x28] sm:$0xff] }
  0x39   :  { %v71_v7 = vld [vmem:[#allocation5 + $0x38] sm:$0xff]  ;;  %v356_v8 = vpack.c.bf16 %v66_v5, %v64_v3  ;;  %v68_v10 = vld [vmem:[#allocation5 + $0x20] sm:$0xff]  ;;  %v70_v11 = vld [vmem:[#allocation5 + $0x30] sm:$0xff] }
  0x3a   :  { %v358_v9 = vpack.c.bf16 %v71_v7, %v69_v6  ;;  %v73_v12 = vld [vmem:[#allocation5 + $0x48] sm:$0xff]  ;;  %355 = vmatprep.subr.bf16.mxu0 %v354_v4  ;;  %v75_v13 = vld [vmem:[#allocation5 + $0x58] sm:$0xff]  ;;  %v360_v14 = vpack.c.bf16 %v70_v11, %v68_v10  ;;  %v72_v15 = vld [vmem:[#allocation5 + $0x40] sm:$0xff] }
  0x3b   :  { %357 = vmatpush1.bf16.msra.mxu0 %v356_v8  ;;  %v362_v16 = vpack.c.bf16 %v75_v13, %v73_v12  ;;  %v74_v17 = vld [vmem:[#allocation5 + $0x50] sm:$0xff]  ;;  %v77_v18 = vld [vmem:[#allocation5 + $0x68] sm:$0xff]  ;;  %v79_v19 = vld [vmem:[#allocation5 + $0x78] sm:$0xff] }
  0x3c   :  { %359 = vmatprep.subr.bf16.mxu0 %v358_v9  ;;  %v175_v20 = vld [vmem:[#allocation7] sm:$0xff]  ;;  %v176_v21 = vld [vmem:[#allocation7 + $0x8] sm:$0xff]  ;;  %v177_v22 = vld [vmem:[#allocation7 + $0x10] sm:$0xff]  ;;  %v364_v25 = vpack.c.bf16 %v74_v17, %v72_v15  ;;  %v366_v29 = vpack.c.bf16 %v79_v19, %v77_v18 }
  0x3d   :  { %v370_v23 = vpack.c.bf16 %v176_v21, %v175_v20  ;;  %v178_v24 = vld [vmem:[#allocation7 + $0x18] sm:$0xff]  ;;  %v179_v27 = vld [vmem:[#allocation7 + $0x20] sm:$0xff]  ;;  %v180_v28 = vld [vmem:[#allocation7 + $0x28] sm:$0xff] }
  0x3e   :  { %v374_v26 = vpack.c.bf16 %v178_v24, %v177_v22  ;;  %v76_v30 = vld [vmem:[#allocation5 + $0x60] sm:$0xff]  ;;  %v78_v31 = vld [vmem:[#allocation5 + $0x70] sm:$0xff]  ;;  %v378_v32 = vpack.c.bf16 %v180_v28, %v179_v27  ;;  %v182_v35 = vld [vmem:[#allocation7 + $0x38] sm:$0xff] }
  0x3f   :  { %361 = vmatpush1.bf16.msra.mxu0 %v360_v14  ;;  %371 = vmatprep.subr.bf16.mxu1 %v370_v23  ;;  %v368_v33 = vpack.c.bf16 %v78_v31, %v76_v30  ;;  %v181_v34 = vld [vmem:[#allocation7 + $0x30] sm:$0xff]  ;;  %v183_v38 = vld [vmem:[#allocation7 + $0x40] sm:$0xff]  ;;  %v184_v39 = vld [vmem:[#allocation7 + $0x48] sm:$0xff] }
  0x40   :  { %363 = vmatprep.subr.bf16.mxu0 %v362_v16  ;;  %373 = vmatpush3.bf16.msra.mxu1 %v370_v23  ;;  %v382_v36 = vpack.c.bf16 %v182_v35, %v181_v34  ;;  %v62_v37 = vld [vmem:[#allocation2] sm:$0xff]  ;;  %v386_v40 = vpack.c.bf16 %v184_v39, %v183_v38  ;;  %v63_v41 = vld [vmem:[#allocation2 + $0x8] sm:$0xff]  ;;  %v187_v45 = vld [vmem:[#allocation7 + $0x60] sm:$0xff] }
  0x41   :  { %375 = vmatprep.subr.bf16.mxu1 %v374_v26  ;;  %v185_v42 = vld [vmem:[#allocation7 + $0x50] sm:$0xff]  ;;  %v186_v43 = vld [vmem:[#allocation7 + $0x58] sm:$0xff]  ;;  %v188_v46 = vld [vmem:[#allocation7 + $0x68] sm:$0xff] }
  0x42   :  { %v390_v44 = vpack.c.bf16 %v186_v43, %v185_v42  ;;  %v394_v47 = vpack.c.bf16 %v188_v46, %v187_v45  ;;  %v189_v48 = vld [vmem:[#allocation7 + $0x70] sm:$0xff]  ;;  %v190_v49 = vld [vmem:[#allocation7 + $0x78] sm:$0xff] }
  0x43   :  { %365 = vmatpush1.bf16.msra.mxu0 %v364_v25  ;;  %v398_v50 = vpack.c.bf16 %v190_v49, %v189_v48  ;;  %v299_v51 = vld [vmem:[%s609_s2] ss:$0 sm:$0xff]  ;;  %s513_s2 = smov [#allocation8]  }
  0x44   :  { %367 = vmatprep.subr.bf16.mxu0 %v366_v29  ;;  %377 = vmatpush3.bf16.msra.mxu1 %v374_v26  ;;  %v300_v60 = vld [vmem:[%s611_s4] ss:$0 sm:$0xff]  ;;  %s284_s9 = sshll.u32 %s513_s2, 4  ;;  %s285_s9 = int_to_ptr.vmem [resolvable:$true] %s284_s9 }
  0x45   :  { %379 = vmatprep.subr.bf16.mxu1 %v378_v32  ;;  %s477_s10 = scalar_lea.vmem %s285_s9, 256  ;;  %p482_p11 = scmp.lt.s32.totalorder %s285_s9, %s285_s9 }
  0x46   :  { %p478_p10 = scmp.ne.s32.totalorder %s285_s9, %s477_s10  ;;  %p483_p12 = scmp.lt.s32.totalorder %s477_s10, %s477_s10 }
  0x47   :  { %369 = vmatpush1.bf16.msra.mxu0 %v368_v33 }
  0x48   :  { %381 = vmatpush3.bf16.msra.mxu1 %v378_v32  ;;  %p484_p13 = por %p483_p12, %p482_p11 }
  0x49   :  { %383 = vmatprep.subr.bf16.mxu1 %v382_v36 }
  0x4a   :  { %297 = vmatmul.mubr.msk.f32.vlgmr.msra.gmra.mrb[0].mxu0 %vm80_vm0, %v62_v37  ;;  %p485_p0 = pnand %p484_p13, %p478_p10 }
  0x4b   :  { %157 = vmatprep.mubr.f32.mxu0 %v512_v0 }
  0x4c   :  { %385 = vmatpush3.bf16.msra.mxu1 %v382_v36 }
  0x4d   :  { %387 = vmatprep.subr.bf16.mxu1 %v386_v40 }
  0x4e   :  { %298 = vmatmul.mubr.msk.f32.gmra.mrb[2].mxu0 %vm80_vm0, %v63_v41 }
  0x50   :  { %389 = vmatpush3.bf16.msra.mxu1 %v386_v40 }
  0x51   :  { %391 = vmatprep.subr.bf16.mxu1 %v390_v44 }
  0x54   :  { %393 = vmatpush3.bf16.msra.mxu1 %v390_v44 }
  0x55   :  { %395 = vmatprep.subr.bf16.mxu1 %v394_v47 }
  0x58   :  { %397 = vmatpush3.bf16.msra.mxu1 %v394_v47 }
  0x59   :  { %399 = vmatprep.subr.bf16.mxu1 %v398_v50 }
  0x5c   :  { %401 = vmatpush3.bf16.msra.mxu1 %v398_v50 }
 0x11d   :  { %v153_v52 = vpop.f32.mrb[0].mxu0 }
 0x11e   :  { %v155_v53 = vpop.f32.mrb[1].mxu0  ;;  %v171_v54 = vadd.f32 %v299_v51, %v153_v52 }
 0x120   :  { %v173_v55 = vmax.f32 %v171_v54, 0.0 }
 0x121   :  { %v159_v56 = vpop.f32.mrb[2].mxu0 }
 0x122   :  { %v172_v57 = vadd.f32 %v299_v51, %v159_v56  ;;  %v161_v58 = vpop.f32.mrb[3].mxu0  ;;  %351 = vmatprep.mubr.f32.mxu1 %v173_v55 }
 0x124   :  { %v174_v59 = vmax.f32 %v172_v57, 0.0 }
 0x126   :  { %352 = vmatmul.mubr.f32.vlgmr.msra.gmra.mrb[0].mxu1 %v174_v59 }
 0x1f9   :  { %v353_v61 = vpop.f32.mrb[0].mxu1 }
 0x1fa   :  { %v270_v62 = vadd.f32 %v353_v61, %v300_v60  ;;  %v264_v63 = vpop.f32.mrb[1].mxu1 }
 0x1fb   :  { %v265_v0 = vadd.f32 %v300_v60, %v264_v63 }
 0x1fc   :  { %v274_v1 = vadd.f32 %v270_v62, %v161_v58 }
 0x1fd   :  { %v273_v2 = vadd.f32 %v265_v0, %v155_v53 }
 0x1fe   :  { %v276_v3 = vmax.f32 %v274_v1, 0.0 }
 0x1ff   :  { %v275_v4 = vmax.f32 %v273_v2, 0.0 }
 0x200   :  { %278 = vst [vmem:[#allocation8 + $0x8] sm:$0xff] %v276_v3 }
 0x201   :  { %277 = vst [vmem:[#allocation8] sm:$0xff] %v275_v4 }
 0x202   :  { %488 = shalt.err (!%p485_p0)
}
 0x203   :  { %s489_s12 = scalar_lea.hbm %s612_s5, 256 }
 0x204   :  { %p490_p1 = scmp.ne.s32.totalorder %s612_s5, %s489_s12  ;;  %p493_p2 = scmp.lt.u32.totalorder %s489_s12, %s612_s5 }
 0x206   :  { %p495_p3 = pnand %p493_p2, %p490_p1 }
 0x208   :  { %498 = shalt.err (!%p495_p3)
}
 0x209   :  { %290 = dma.vmem_to_hbm [thread:$0]  %s285_s9, 256, %s612_s5, [#allocation4], %s509_s1, %s509_s1, %s510_s17  }
 0x20a   :  { %503 = dma.done.wait [#allocation4], 256  }
 0x20b   :  { %504 = vsyncadd [#allocation4], 4294967040 }
 0x20c   :  { %294 = vsyncpa [#allocation3], 1 }
 0x20d   :  { %295 = vsyncpa [#allocation6], 1 }
 0x20e   :  { %296 = vsyncpa [#allocation4], 1 }

</bundles_post_ra>
